<compile_context>
chip_gen: v6e
topology: v6e:2x2x1
jax: 0.10.0
libtpu: 0.0.40
codegen_flags: <defaults>
</compile_context>

<pallas_src>
import functools

import jax
import jax.numpy as jnp
from jax.experimental import pallas as pl
from jax.experimental.pallas import tpu as pltpu

_LANES = 128
_MAX_TILE_ROWS = 2048  # 1 MiB per f32 input block; 4 MiB total double-buffered


def _round_up(x, m):
    return (x + m - 1) // m * m


def _cdiv(a, b):
    return (a + b - 1) // b


def _num_tensorcores():
    # Only v7x has 2 TensorCores per chip; on v5e/v6e a 2-way leading grid
    # axis is just a serial 2x loop with extra per-step overhead.
    try:
        kind = jax.devices()[0].device_kind.lower()
        if "v7" in kind:
            return 2
    except Exception:
        pass
    return 1


def _ratio_mse_kernel(o_ref, t_ref, ratio_ref, sq_ref, *, eps, g1_steps):
    # o_ref / t_ref   : VMEM (tile_rows, 128) input blocks (native dtype).
    # ratio_ref/sq_ref: VMEM (8, 128) f32 per-core partial sums.  Their block
    #                   index is constant along the g1 axis, so they stay
    #                   resident in VMEM and act as accumulators (P3 pattern).
    g1 = pl.program_id(1)

    @pl.when(g1 == 0)
    def _init():
        ratio_ref[...] = jnp.zeros_like(ratio_ref)
        sq_ref[...] = jnp.zeros_like(sq_ref)

    o = o_ref[...].astype(jnp.float32)
    t = t_ref[...].astype(jnp.float32)

    d = t - o
    x = jnp.abs(t) + eps
    # EUP reciprocal (otherwise-idle slot) + one Newton-Raphson refinement
    # step (2 mul + 1 sub on the VPU) -> ~full f32 precision.
    r = pl.reciprocal(x, approx=True)
    r = r * (2.0 - x * r)
    ratio = jnp.abs(d) * r
    sq = d * d

    # Fold the (tile_rows, 128) contributions down to one vreg-shaped (8, 128)
    # partial.  The reshape keeps (8, 128) tiles intact and the sum over the
    # leading axis is pure VALU adds — no XLU work, no large accumulator
    # round-tripping through VMEM.  Zero-padded rows contribute exactly 0.
    tr = ratio.shape[0]
    ratio_ref[...] += ratio.reshape(tr // 8, 8, _LANES).sum(axis=0)
    sq_ref[...] += sq.reshape(tr // 8, 8, _LANES).sum(axis=0)


def ratio_loss_with_mse(output, target, current_iter, total_iters,
                        min_weight=0.001, max_weight=1.0,
                        return_losses=False):
    """Pallas TPU implementation of RatioLossWithMSELoss.forward."""
    assert output.shape == target.shape
    total = 1
    for d in output.shape:
        total *= d

    itemsize = jnp.dtype(output.dtype).itemsize
    # Sublane tiling requirement: 8 rows for f32, 16 for bf16, 32 for int8.
    sub = max(8, 32 // max(1, itemsize))

    nsplit = _num_tensorcores()
    rows = _cdiv(total, _LANES)

    # Pick an even tiling: nsplit * g1_steps * tile_rows == padded_rows, so
    # there are no clamped duplicate tiles and no in-kernel masking is needed.
    target_rows = max(sub, min(_MAX_TILE_ROWS, _round_up(rows, sub)))
    g1_steps = max(1, _cdiv(rows, nsplit * target_rows))
    tile_rows = _round_up(_cdiv(rows, nsplit * g1_steps), sub)
    padded_rows = nsplit * g1_steps * tile_rows
    padded_total = padded_rows * _LANES

    # Flatten (any shape / size accepted) and zero-pad to the tiled extent.
    o_flat = output.reshape(-1)
    t_flat = target.reshape(-1)
    if padded_total != total:
        o_flat = jnp.pad(o_flat, (0, padded_total - total))
        t_flat = jnp.pad(t_flat, (0, padded_total - total))
    o2 = o_flat.reshape(padded_rows, _LANES)
    t2 = t_flat.reshape(padded_rows, _LANES)

    # eps is stored as bfloat16 in the PyTorch module, then promoted on add.
    eps = float(jnp.asarray(0.001, dtype=jnp.bfloat16).astype(jnp.float32))

    kernel = functools.partial(_ratio_mse_kernel, eps=eps, g1_steps=g1_steps)

    in_map = lambda g0, g1: (g0 * g1_steps + g1, 0)
    out_map = lambda g0, g1: (g0, 0)

    ratio_parts, sq_parts = pl.pallas_call(
        kernel,
        out_shape=(
            jax.ShapeDtypeStruct((nsplit * 8, _LANES), jnp.float32),
            jax.ShapeDtypeStruct((nsplit * 8, _LANES), jnp.float32),
        ),
        grid_spec=pltpu.PrefetchScalarGridSpec(
            num_scalar_prefetch=0,
            grid=(nsplit, g1_steps),
            in_specs=[
                pl.BlockSpec((tile_rows, _LANES), in_map),
                pl.BlockSpec((tile_rows, _LANES), in_map),
            ],
            out_specs=[
                pl.BlockSpec((8, _LANES), out_map),
                pl.BlockSpec((8, _LANES), out_map),
            ],
        ),
        compiler_params=pltpu.CompilerParams(
            dimension_semantics=("parallel", "arbitrary")),
    )(o2, t2)

    # Tiny final reduction + scale by the true 1/N (multiply, not divide).
    inv_n = 1.0 / total
    ratio_mean = jnp.sum(ratio_parts) * inv_n
    mse = jnp.sum(sq_parts) * inv_n
    weight = min_weight + (max_weight - min_weight) * (current_iter / total_iters)
    loss = weight * ratio_mean + mse
    if return_losses:
        # Equivalent of the PyTorch module's self.losses side effect.
        return loss, {"ratio": ratio_mean, "mse": mse}
    return loss


def _reference(output, target, current_iter, total_iters,
               min_weight=0.001, max_weight=1.0):
    eps = jnp.asarray(0.001, dtype=jnp.bfloat16).astype(jnp.float32)
    weight = min_weight + (max_weight - min_weight) * (current_iter / total_iters)
    loss = jnp.abs(target - output) / (jnp.abs(target) + eps)
    return weight * jnp.mean(loss) + jnp.mean((output - target) ** 2)


if __name__ == "__main__":
    key = jax.random.PRNGKey(0)
    k1, k2 = jax.random.split(key)
    # Small NCHW tensors consistent with a typical conv-output loss.
    output = jax.random.normal(k1, (2, 4, 16, 16), dtype=jnp.float32)
    target = jax.random.normal(k2, (2, 4, 16, 16), dtype=jnp.float32)

    total_iters = 100
    current_iter = 25

    loss = ratio_loss_with_mse(output, target, current_iter, total_iters)
    loss = jax.block_until_ready(loss)

    ref = _reference(output, target, current_iter, total_iters)
    assert jnp.allclose(loss, ref, rtol=1e-4, atol=1e-6), (loss, ref)

    print("KERNEL_OK")
</pallas_src>

<mosaic_0001>
module attributes {stable_mosaic.version = 11 : i64} {
  func.func @_ratio_mse_kernel(%arg0: i32, %arg1: i32, %arg2: memref<16x128xf32, #tpu.memory_space<vmem>>, %arg3: memref<16x128xf32, #tpu.memory_space<vmem>>, %arg4: memref<8x128xf32, #tpu.memory_space<vmem>>, %arg5: memref<8x128xf32, #tpu.memory_space<vmem>>) attributes {dimension_semantics = [#tpu.dimension_semantics<parallel>, #tpu.dimension_semantics<arbitrary>], iteration_bounds = array<i64: 1, 1>, scalar_prefetch = 0 : i64, scratch_operands = 0 : i64, tpu.core_type = #tpu.core_type<tc>, window_params = [{transform_indices = @transform_0, window_bounds = array<i64: 16, 128>}, {transform_indices = @transform_1, window_bounds = array<i64: 16, 128>}, {transform_indices = @transform_2, window_bounds = array<i64: 8, 128>}, {transform_indices = @transform_3, window_bounds = array<i64: 8, 128>}]} {
    %c0_i32 = arith.constant 0 : i32
    %0 = arith.cmpi eq, %arg1, %c0_i32 : i32
    %1 = arith.extui %0 : i1 to i32
    %c0_i32_0 = arith.constant 0 : i32
    %2 = arith.cmpi ne, %1, %c0_i32_0 : i32
    scf.if %2 {
      %cst_15 = arith.constant 0.000000e+00 : f32
      %27 = vector.broadcast %cst_15 : f32 to vector<8x128xf32>
      %c0_16 = arith.constant 0 : index
      %c0_17 = arith.constant 0 : index
      %28 = vector.load %arg4[%c0_16, %c0_17] : memref<8x128xf32, #tpu.memory_space<vmem>>, vector<8x128xf32>
      tpu.vector_store %arg4[%c0_16, %c0_17], %27 {strides = array<i32>} : memref<8x128xf32, #tpu.memory_space<vmem>>, vector<8x128xf32>,
      %cst_18 = arith.constant 0.000000e+00 : f32
      %29 = vector.broadcast %cst_18 : f32 to vector<8x128xf32>
      %c0_19 = arith.constant 0 : index
      %c0_20 = arith.constant 0 : index
      %30 = vector.load %arg5[%c0_19, %c0_20] : memref<8x128xf32, #tpu.memory_space<vmem>>, vector<8x128xf32>
      tpu.vector_store %arg5[%c0_19, %c0_20], %29 {strides = array<i32>} : memref<8x128xf32, #tpu.memory_space<vmem>>, vector<8x128xf32>,
    } else {
    }
    %c0 = arith.constant 0 : index
    %c0_1 = arith.constant 0 : index
    %3 = vector.load %arg2[%c0, %c0_1] : memref<16x128xf32, #tpu.memory_space<vmem>>, vector<16x128xf32>
    %c0_2 = arith.constant 0 : index
    %c0_3 = arith.constant 0 : index
    %4 = vector.load %arg3[%c0_2, %c0_3] : memref<16x128xf32, #tpu.memory_space<vmem>>, vector<16x128xf32>
    %5 = arith.subf %4, %3 : vector<16x128xf32>
    %6 = math.absf %4 : vector<16x128xf32>
    %cst = arith.constant 9.99450683E-4 : f32
    %7 = vector.broadcast %cst : f32 to vector<16x128xf32>
    %8 = arith.addf %6, %7 : vector<16x128xf32>
    %9 = tpu.reciprocal %8 {approx = true} : vector<16x128xf32> -> vector<16x128xf32>
    %10 = arith.mulf %8, %9 : vector<16x128xf32>
    %cst_4 = arith.constant 2.000000e+00 : f32
    %11 = vector.broadcast %cst_4 : f32 to vector<16x128xf32>
    %12 = arith.subf %11, %10 : vector<16x128xf32>
    %13 = arith.mulf %9, %12 : vector<16x128xf32>
    %14 = math.absf %5 : vector<16x128xf32>
    %15 = arith.mulf %14, %13 : vector<16x128xf32>
    %16 = arith.mulf %5, %5 : vector<16x128xf32>
    %c0_5 = arith.constant 0 : index
    %c0_6 = arith.constant 0 : index
    %17 = vector.load %arg4[%c0_5, %c0_6] : memref<8x128xf32, #tpu.memory_space<vmem>>, vector<8x128xf32>
    %18 = vector.shape_cast %15 : vector<16x128xf32> to vector<2x8x128xf32>
    %cst_7 = arith.constant dense<0.000000e+00> : vector<8x128xf32>
    %19 = vector.multi_reduction <add>, %18, %cst_7 [0] : vector<2x8x128xf32> to vector<8x128xf32>
    %20 = arith.addf %17, %19 : vector<8x128xf32>
    %c0_8 = arith.constant 0 : index
    %c0_9 = arith.constant 0 : index
    %21 = vector.load %arg4[%c0_8, %c0_9] : memref<8x128xf32, #tpu.memory_space<vmem>>, vector<8x128xf32>
    tpu.vector_store %arg4[%c0_8, %c0_9], %20 {strides = array<i32>} : memref<8x128xf32, #tpu.memory_space<vmem>>, vector<8x128xf32>,
    %c0_10 = arith.constant 0 : index
    %c0_11 = arith.constant 0 : index
    %22 = vector.load %arg5[%c0_10, %c0_11] : memref<8x128xf32, #tpu.memory_space<vmem>>, vector<8x128xf32>
    %23 = vector.shape_cast %16 : vector<16x128xf32> to vector<2x8x128xf32>
    %cst_12 = arith.constant dense<0.000000e+00> : vector<8x128xf32>
    %24 = vector.multi_reduction <add>, %23, %cst_12 [0] : vector<2x8x128xf32> to vector<8x128xf32>
    %25 = arith.addf %22, %24 : vector<8x128xf32>
    %c0_13 = arith.constant 0 : index
    %c0_14 = arith.constant 0 : index
    %26 = vector.load %arg5[%c0_13, %c0_14] : memref<8x128xf32, #tpu.memory_space<vmem>>, vector<8x128xf32>
    tpu.vector_store %arg5[%c0_13, %c0_14], %25 {strides = array<i32>} : memref<8x128xf32, #tpu.memory_space<vmem>>, vector<8x128xf32>,
    return
  }
  func.func @transform_0(%arg0: i32, %arg1: i32) -> (i32, i32) {
    %c1_i32 = arith.constant 1 : i32
    %0 = arith.muli %arg0, %c1_i32 : i32
    %1 = arith.addi %0, %arg1 : i32
    %c0_i32 = arith.constant 0 : i32
    %c0_i32_0 = arith.constant 0 : i32
    return %1, %c0_i32 : i32, i32
  }
  func.func @transform_1(%arg0: i32, %arg1: i32) -> (i32, i32) {
    %c1_i32 = arith.constant 1 : i32
    %0 = arith.muli %arg0, %c1_i32 : i32
    %1 = arith.addi %0, %arg1 : i32
    %c0_i32 = arith.constant 0 : i32
    %c0_i32_0 = arith.constant 0 : i32
    return %1, %c0_i32 : i32, i32
  }
  func.func @transform_2(%arg0: i32, %arg1: i32) -> (i32, i32) {
    %c0_i32 = arith.constant 0 : i32
    %c0_i32_0 = arith.constant 0 : i32
    return %arg0, %c0_i32 : i32, i32
  }
  func.func @transform_3(%arg0: i32, %arg1: i32) -> (i32, i32) {
    %c0_i32 = arith.constant 0 : i32
    %c0_i32_0 = arith.constant 0 : i32
    return %arg0, %c0_i32 : i32, i32
  }
}

</mosaic_0001>

<bundles_post_ra>
// kernel: tpu_custom_call.1
= control target key start
LH: loop header
LB: loop body
LE: loop exit
PB: predicated region body
PF: predicated region fallthrough
CT: control target
= control target key end

     0   :  { %9 = vsyncpa [#allocation3], 0  ;;  %s260_s0 = inlined_call_operand.hbm [shape: f32[16,128], index: 0, kind: input, shape index: {}]   ;;  %s261_s1 = inlined_call_operand.hbm [shape: f32[16,128], index: 1, kind: input, shape index: {}]   ;;  %s262_s2 = inlined_call_operand.hbm [shape: f32[8,128], index: 2, kind: output, shape index: {0}]   ;;  %s263_s3 = inlined_call_operand.hbm [shape: f32[8,128], index: 3, kind: output, shape index: {1}]  }
   0x1   :  { %10 = vsyncpa [#allocation6], 0 }
   0x2   :  { %11 = vsyncpa [#allocation4], 0 }
   0x3   :  { %12 = vsyncpa [#allocation9], 0  ;;  %s222_s12 = smov [#allocation2]  }
   0x4   :  { %s22_s13 = sshll.u32 %s222_s12, 4  ;;  %s23_s13 = int_to_ptr.vmem [resolvable:$true] %s22_s13 }
   0x5   :  { %s142_s14 = scalar_lea.vmem %s23_s13, 256  ;;  %p147_p1 = scmp.lt.s32.totalorder %s23_s13, %s23_s13 }
   0x6   :  { %p143_p0 = scmp.ne.s32.totalorder %s23_s13, %s142_s14  ;;  %p148_p2 = scmp.lt.s32.totalorder %s142_s14, %s142_s14 }
   0x8   :  { %p149_p3 = por %p148_p2, %p147_p1 }
   0xa   :  { %p150_p4 = pnand %p149_p3, %p143_p0 }
   0xc   :  { %153 = shalt.err (!%p150_p4)
}
   0xd   :  { %s223_s15 = smov 128   ;;  %s224_s16 = smov 8  }
   0xe   :  { %28 = dma.hbm_to_vmem [thread:$0]  %s260_s0, 256, %s23_s13, [#allocation3], %s223_s15, %s223_s15, %s224_s16  }
   0xf   :  { %s225_s19 = smov [#allocation5]  }
  0x10   :  { %s38_s20 = sshll.u32 %s225_s19, 4  ;;  %s39_s20 = int_to_ptr.vmem [resolvable:$true] %s38_s20 }
  0x11   :  { %s162_s21 = scalar_lea.vmem %s39_s20, 256  ;;  %p167_p6 = scmp.lt.s32.totalorder %s39_s20, %s39_s20 }
  0x12   :  { %p163_p5 = scmp.ne.s32.totalorder %s39_s20, %s162_s21  ;;  %p168_p7 = scmp.lt.s32.totalorder %s162_s21, %s162_s21 }
  0x14   :  { %p169_p8 = por %p168_p7, %p167_p6 }
  0x16   :  { %p170_p9 = pnand %p169_p8, %p163_p5 }
  0x18   :  { %173 = shalt.err (!%p170_p9)
}
  0x19   :  { %44 = dma.hbm_to_vmem [thread:$0]  %s261_s1, 256, %s39_s20, [#allocation6], %s223_s15, %s223_s15, %s224_s16  }
  0x1a   :  { %214 = dma.done.wait [#allocation3], 256  }
  0x1b   :  { %215 = vsyncadd [#allocation3], 4294967040 }
  0x1c   :  { %216 = dma.done.wait [#allocation6], 256  }
  0x1d   :  { %217 = vsyncadd [#allocation6], 4294967040  ;;  %v61_v0 = vld [vmem:[#allocation2] sm:$0xff]  ;;  %v62_v1 = vld [vmem:[#allocation2 + $0x8] sm:$0xff]  ;;  %s226_s0 = smov [#allocation8]  }
  0x1e   :  { %v63_v2 = vld [vmem:[#allocation5] sm:$0xff]  ;;  %v64_v3 = vld [vmem:[#allocation5 + $0x8] sm:$0xff]  ;;  %s109_s24 = sshll.u32 %s226_s0, 4  ;;  %s110_s24 = int_to_ptr.vmem [resolvable:$true] %s109_s24 }
  0x1f   :  { %v65_v4 = vsub.f32 %v63_v2, %v61_v0  ;;  %v67_v5 = vand.u32 2147483647, %v63_v2  ;;  %v66_v6 = vsub.f32 %v64_v3, %v62_v1  ;;  %v68_v7 = vand.u32 2147483647, %v64_v3  ;;  %s174_s1 = scalar_lea.vmem %s110_s24, 128  ;;  %p179_p11 = scmp.lt.s32.totalorder %s110_s24, %s110_s24 }
  0x20   :  { %p175_p10 = scmp.ne.s32.totalorder %s110_s24, %s174_s1  ;;  %p180_p12 = scmp.lt.s32.totalorder %s174_s1, %s174_s1 }
  0x21   :  { %v69_v8 = vadd.f32 0.0009994507, %v67_v5  ;;  %v83_v9 = vmul.f32 %v65_v4, %v65_v4  ;;  %v70_v10 = vadd.f32 0.0009994507, %v68_v7  ;;  %v84_v11 = vmul.f32 %v66_v6, %v66_v6 }
  0x22   :  { %p181_p13 = por %p180_p12, %p179_p11 }
  0x23   :  { %130 = vrcp.f32 %v69_v8  ;;  %v90_v12 = vadd.f32 %v84_v11, %v83_v9 }
  0x24   :  { %132 = vrcp.f32 %v70_v10  ;;  %p182_p0 = pnand %p181_p13, %p175_p10 }
  0x25   :  { %92 = vst [vmem:[#allocation8] sm:$0xff] %v90_v12 }
  0x26   :  { %185 = shalt.err (!%p182_p0)
}
  0x27   :  { %112 = dma.vmem_to_hbm [thread:$0]  %s110_s24, 128, %s263_s3, [#allocation9]   ;;  %v79_v18 = vand.u32 2147483647, %v65_v4  ;;  %v80_v20 = vand.u32 2147483647, %v66_v6 }
  0x28   :  { %s227_s27 = smov [#allocation7]  }
  0x29   :  { %s99_s28 = sshll.u32 %s227_s27, 4  ;;  %s100_s28 = int_to_ptr.vmem [resolvable:$true] %s99_s28 }
  0x2a   :  { %s194_s29 = scalar_lea.vmem %s100_s28, 128  ;;  %p199_p2 = scmp.lt.s32.totalorder %s100_s28, %s100_s28 }
  0x2b   :  { %p195_p1 = scmp.ne.s32.totalorder %s100_s28, %s194_s29  ;;  %p200_p3 = scmp.lt.s32.totalorder %s194_s29, %s194_s29 }
  0x2d   :  { %p201_p4 = por %p200_p3, %p199_p2 }
  0x2f   :  { %p202_p5 = pnand %p201_p4, %p195_p1 }
  0x30   :  { %v131_v13 = vpop.eup %130 }
  0x31   :  { %v133_v14 = vpop.eup %132  ;;  %v73_v15 = vmul.f32 %v131_v13, %v69_v8 }
  0x32   :  { %v74_v16 = vmul.f32 %v133_v14, %v70_v10 }
  0x33   :  { %v75_v17 = vsub.f32 2.0, %v73_v15 }
  0x34   :  { %v76_v19 = vsub.f32 2.0, %v74_v16 }
  0x35   :  { %v77_v21 = vmul.f32 %v131_v13, %v75_v17 }
  0x36   :  { %v78_v22 = vmul.f32 %v133_v14, %v76_v19 }
  0x37   :  { %v81_v23 = vmul.f32 %v79_v18, %v77_v21 }
  0x38   :  { %v82_v24 = vmul.f32 %v80_v20, %v78_v22 }
  0x3a   :  { %v86_v25 = vadd.f32 %v82_v24, %v81_v23 }
  0x3c   :  { %88 = vst [vmem:[#allocation7] sm:$0xff] %v86_v25 }
  0x3d   :  { %205 = shalt.err (!%p202_p5)
}
  0x3e   :  { %102 = dma.vmem_to_hbm [thread:$0]  %s100_s28, 128, %s262_s2, [#allocation4]  }
  0x3f   :  { %218 = dma.done.wait [#allocation4], 128  }
  0x40   :  { %219 = vsyncadd [#allocation4], 4294967168 }
  0x41   :  { %220 = dma.done.wait [#allocation9], 128  }
  0x42   :  { %221 = vsyncadd [#allocation9], 4294967168 }
  0x43   :  { %119 = vsyncpa [#allocation3], 1 }
  0x44   :  { %120 = vsyncpa [#allocation6], 1 }
  0x45   :  { %121 = vsyncpa [#allocation4], 1 }
  0x46   :  { %122 = vsyncpa [#allocation9], 1 }

</bundles_post_ra>
